<compile_context>
chip_gen: v7x
topology: tpu7x:2x2x1
jax: 0.10.0
libtpu: 0.0.40
codegen_flags: <defaults>
</compile_context>

<pallas_src>
import functools

import jax
import jax.numpy as jnp
from jax import lax
from jax.experimental import pallas as pl
from jax.experimental.pallas import tpu as pltpu

LN_EPS = 1e-5      # PyTorch nn.LayerNorm default
LANES = 128        # TPU lane width
SUBLANES = 8       # TPU sublane count (f32)


def _round_up(x, m):
    return ((x + m - 1) // m) * m


def _pad2d(a, shape):
    return jnp.pad(a, [(0, s - d) for d, s in zip(a.shape, shape)])


# ---------------------------------------------------------------------------
# Fused kernel: one batch tile through the whole MLP.
#   refs layout: x_ref, [w, b, gamma, beta] * n_hidden, w_final, b_final, o_ref
# ---------------------------------------------------------------------------
def _fused_mlp_kernel(n_hidden, inv_real_dims, x_ref, *refs):
    o_ref = refs[-1]
    h = x_ref[...].astype(jnp.float32)

    idx = 0
    for li in range(n_hidden):
        w_ref, b_ref, g_ref, be_ref = refs[idx:idx + 4]
        idx += 4
        # Linear (MXU, fp32 accumulate). Padded weight cols/rows are zero.
        # TODO(synk): for v6e/v7x, cast h and w to bf16 here (keep f32 accumulate)
        # to halve VMEM traffic / double MXU rate; needs looser test tolerance.
        h = jnp.dot(h, w_ref[...], preferred_element_type=jnp.float32)
        h = h + b_ref[...]                       # (1, Hp) broadcast, loaded once
        # LayerNorm over the REAL feature count (padded lanes are exactly 0 and
        # contribute nothing to the sums). One-pass variance: E[x^2] - E[x]^2.
        inv_h = inv_real_dims[li]
        s1 = jnp.sum(h, axis=-1, keepdims=True)
        s2 = jnp.sum(h * h, axis=-1, keepdims=True)
        mean = s1 * inv_h
        var = s2 * inv_h - mean * mean
        h = (h - mean) * lax.rsqrt(var + LN_EPS)
        # Affine: gamma/beta are zero in padded lanes -> padded lanes return to 0.
        h = h * g_ref[...] + be_ref[...]
        # TODO(synk): nn.Dropout omitted (inference-mode identity); add
        # pltpu.prng_seed/prng_random_bits mask for training mode.
        h = jnp.maximum(h, 0.0)                  # ReLU

    wf_ref, bf_ref = refs[idx], refs[idx + 1]
    out = jnp.dot(h, wf_ref[...], preferred_element_type=jnp.float32) + bf_ref[...]
    o_ref[...] = out.astype(o_ref.dtype)


# ---------------------------------------------------------------------------
# Wrapper: pad everything to lane-dense tiles, tile the batch axis only.
# ---------------------------------------------------------------------------
@functools.partial(jax.jit, static_argnames=("block_b",))
def feature_encoder_forward(params, x, block_b=256):
    B, Din = x.shape
    hidden = params["hidden"]
    wf, bf = params["final"]

    # Real and lane-padded feature dims per layer boundary.
    dims = [Din] + [w.shape[1] for (w, _, _, _) in hidden] + [wf.shape[1]]
    pdims = [_round_up(d, LANES) for d in dims]

    # Batch tiling: sublane-aligned tile, batch padded to a tile multiple.
    tb = min(block_b, _round_up(B, SUBLANES))
    Bp = _round_up(B, tb)

    xp = _pad2d(x.astype(jnp.float32), (Bp, pdims[0]))

    flat_params = []
    in_specs = [pl.BlockSpec((tb, pdims[0]), lambda i: (i, 0))]
    for li, (w, b, g, be) in enumerate(hidden):
        pi, po = pdims[li], pdims[li + 1]
        flat_params += [
            _pad2d(w, (pi, po)),
            _pad2d(b.reshape(1, -1), (1, po)),
            _pad2d(g.reshape(1, -1), (1, po)),
            _pad2d(be.reshape(1, -1), (1, po)),
        ]
        in_specs += [
            pl.BlockSpec((pi, po), lambda i: (0, 0)),   # weight: VMEM-resident
            pl.BlockSpec((1, po), lambda i: (0, 0)),    # bias
            pl.BlockSpec((1, po), lambda i: (0, 0)),    # gamma
            pl.BlockSpec((1, po), lambda i: (0, 0)),    # beta
        ]
    pi, po = pdims[-2], pdims[-1]
    flat_params += [_pad2d(wf, (pi, po)), _pad2d(bf.reshape(1, -1), (1, po))]
    in_specs += [
        pl.BlockSpec((pi, po), lambda i: (0, 0)),
        pl.BlockSpec((1, po), lambda i: (0, 0)),
    ]

    kernel = functools.partial(
        _fused_mlp_kernel,
        len(hidden),
        tuple(1.0 / float(d) for d in dims[1:-1]),  # real LN feature counts
    )

    out = pl.pallas_call(
        kernel,
        out_shape=jax.ShapeDtypeStruct((Bp, pdims[-1]), jnp.float32),
        grid=(Bp // tb,),
        in_specs=in_specs,
        out_specs=pl.BlockSpec((tb, pdims[-1]), lambda i: (i, 0)),
        compiler_params=pltpu.CompilerParams(
            dimension_semantics=("parallel",)),   # shard batch tiles across TCs (v7x)
    )(xp, *flat_params)

    return out[:B, :dims[-1]]


# ---------------------------------------------------------------------------
# Parameter construction (matches nn.Linear / nn.LayerNorm shapes & init bounds)
# ---------------------------------------------------------------------------
def init_feature_encoder(key, input_dim, hidden_dims, output_dim):
    params = {"hidden": [], "final": None}
    prev = input_dim
    for h in hidden_dims:
        key, kw, kb = jax.random.split(key, 3)
        bound = 1.0 / jnp.sqrt(prev)
        w = jax.random.uniform(kw, (prev, h), jnp.float32, -bound, bound)
        b = jax.random.uniform(kb, (h,), jnp.float32, -bound, bound)
        gamma = jnp.ones((h,), jnp.float32)
        beta = jnp.zeros((h,), jnp.float32)
        params["hidden"].append((w, b, gamma, beta))
        prev = h
    key, kw, kb = jax.random.split(key, 3)
    bound = 1.0 / jnp.sqrt(prev)
    wf = jax.random.uniform(kw, (prev, output_dim), jnp.float32, -bound, bound)
    bf = jax.random.uniform(kb, (output_dim,), jnp.float32, -bound, bound)
    params["final"] = (wf, bf)
    return params


# Pure-JAX reference for sanity checking.
def feature_encoder_ref(params, x):
    h = x
    for (w, b, gamma, beta) in params["hidden"]:
        h = h @ w + b
        mean = h.mean(-1, keepdims=True)
        var = ((h - mean) ** 2).mean(-1, keepdims=True)
        h = (h - mean) / jnp.sqrt(var + LN_EPS) * gamma + beta
        h = jnp.maximum(h, 0.0)
    wf, bf = params["final"]
    return h @ wf + bf


if __name__ == "__main__":
    # Shapes consistent with the module: batch=8, input_dim=32,
    # hidden_dims=[64, 64], output_dim=16.
    batch, input_dim, hidden_dims, output_dim = 8, 32, [64, 64], 16

    key = jax.random.PRNGKey(0)
    key, kx = jax.random.split(key)
    x = jax.random.normal(kx, (batch, input_dim), jnp.float32)

    params = init_feature_encoder(key, input_dim, hidden_dims, output_dim)

    out = feature_encoder_forward(params, x)
    out = jax.block_until_ready(out)

    ref = feature_encoder_ref(params, x)
    assert out.shape == (batch, output_dim)
    assert jnp.allclose(out, ref, atol=1e-4, rtol=1e-4), "mismatch vs reference"

    print("KERNEL_OK")
</pallas_src>

<mosaic_0001>
module attributes {stable_mosaic.version = 11 : i64} {
  func.func @_fused_mlp_kernel(%arg0: i32, %arg1: memref<8x128xf32, #tpu.memory_space<vmem>>, %arg2: memref<128x128xf32, #tpu.memory_space<vmem>>, %arg3: memref<1x128xf32, #tpu.memory_space<vmem>>, %arg4: memref<1x128xf32, #tpu.memory_space<vmem>>, %arg5: memref<1x128xf32, #tpu.memory_space<vmem>>, %arg6: memref<128x128xf32, #tpu.memory_space<vmem>>, %arg7: memref<1x128xf32, #tpu.memory_space<vmem>>, %arg8: memref<1x128xf32, #tpu.memory_space<vmem>>, %arg9: memref<1x128xf32, #tpu.memory_space<vmem>>, %arg10: memref<128x128xf32, #tpu.memory_space<vmem>>, %arg11: memref<1x128xf32, #tpu.memory_space<vmem>>, %arg12: memref<8x128xf32, #tpu.memory_space<vmem>>) attributes {dimension_semantics = [#tpu.dimension_semantics<parallel>], iteration_bounds = array<i64: 1>, scalar_prefetch = 0 : i64, scratch_operands = 0 : i64, tpu.core_type = #tpu.core_type<tc>, window_params = [{transform_indices = @transform_0, window_bounds = array<i64: 8, 128>}, {pipeline_mode = #tpu.pipeline_mode<synchronous>, transform_indices = @transform_1, window_bounds = array<i64: 128, 128>}, {pipeline_mode = #tpu.pipeline_mode<synchronous>, transform_indices = @transform_2, window_bounds = array<i64: 1, 128>}, {pipeline_mode = #tpu.pipeline_mode<synchronous>, transform_indices = @transform_3, window_bounds = array<i64: 1, 128>}, {pipeline_mode = #tpu.pipeline_mode<synchronous>, transform_indices = @transform_4, window_bounds = array<i64: 1, 128>}, {pipeline_mode = #tpu.pipeline_mode<synchronous>, transform_indices = @transform_5, window_bounds = array<i64: 128, 128>}, {pipeline_mode = #tpu.pipeline_mode<synchronous>, transform_indices = @transform_6, window_bounds = array<i64: 1, 128>}, {pipeline_mode = #tpu.pipeline_mode<synchronous>, transform_indices = @transform_7, window_bounds = array<i64: 1, 128>}, {pipeline_mode = #tpu.pipeline_mode<synchronous>, transform_indices = @transform_8, window_bounds = array<i64: 1, 128>}, {pipeline_mode = #tpu.pipeline_mode<synchronous>, transform_indices = @transform_9, window_bounds = array<i64: 128, 128>}, {pipeline_mode = #tpu.pipeline_mode<synchronous>, transform_indices = @transform_10, window_bounds = array<i64: 1, 128>}, {transform_indices = @transform_11, window_bounds = array<i64: 8, 128>}]} {
    %c0 = arith.constant 0 : index
    %c0_0 = arith.constant 0 : index
    %0 = vector.load %arg1[%c0, %c0_0] : memref<8x128xf32, #tpu.memory_space<vmem>>, vector<8x128xf32>
    %c0_1 = arith.constant 0 : index
    %c0_2 = arith.constant 0 : index
    %1 = vector.load %arg2[%c0_1, %c0_2] : memref<128x128xf32, #tpu.memory_space<vmem>>, vector<128x128xf32>
    %cst = arith.constant dense<0.000000e+00> : vector<8x128xf32>
    %2 = tpu.matmul %0, %1, %cst {dimension_numbers = #tpu.dot_dimension_numbers<[1], [0], [0], [1], [0, 0, 1, 1], [], []>} : vector<8x128xf32>, vector<128x128xf32>, vector<8x128xf32> -> vector<8x128xf32>
    %c0_3 = arith.constant 0 : index
    %c0_4 = arith.constant 0 : index
    %3 = vector.load %arg3[%c0_3, %c0_4] : memref<1x128xf32, #tpu.memory_space<vmem>>, vector<1x128xf32>
    %4 = vector.broadcast %3 : vector<1x128xf32> to vector<8x128xf32>
    %5 = arith.addf %2, %4 : vector<8x128xf32>
    %cst_5 = arith.constant dense<0.000000e+00> : vector<8xf32>
    %6 = vector.multi_reduction <add>, %5, %cst_5 [1] : vector<8x128xf32> to vector<8xf32>
    %7 = vector.shape_cast %6 : vector<8xf32> to vector<8x1xf32>
    %8 = arith.mulf %5, %5 : vector<8x128xf32>
    %cst_6 = arith.constant dense<0.000000e+00> : vector<8xf32>
    %9 = vector.multi_reduction <add>, %8, %cst_6 [1] : vector<8x128xf32> to vector<8xf32>
    %10 = vector.shape_cast %9 : vector<8xf32> to vector<8x1xf32>
    %cst_7 = arith.constant 1.562500e-02 : f32
    %11 = vector.broadcast %cst_7 : f32 to vector<8x1xf32>
    %12 = arith.mulf %7, %11 : vector<8x1xf32>
    %cst_8 = arith.constant 1.562500e-02 : f32
    %13 = vector.broadcast %cst_8 : f32 to vector<8x1xf32>
    %14 = arith.mulf %10, %13 : vector<8x1xf32>
    %15 = arith.mulf %12, %12 : vector<8x1xf32>
    %16 = arith.subf %14, %15 : vector<8x1xf32>
    %17 = vector.broadcast %12 : vector<8x1xf32> to vector<8x128xf32>
    %18 = arith.subf %5, %17 : vector<8x128xf32>
    %cst_9 = arith.constant 9.99999974E-6 : f32
    %19 = vector.broadcast %cst_9 : f32 to vector<8x1xf32>
    %20 = arith.addf %16, %19 : vector<8x1xf32>
    %21 = math.rsqrt %20 : vector<8x1xf32>
    %22 = vector.broadcast %21 : vector<8x1xf32> to vector<8x128xf32>
    %23 = arith.mulf %18, %22 : vector<8x128xf32>
    %c0_10 = arith.constant 0 : index
    %c0_11 = arith.constant 0 : index
    %24 = vector.load %arg4[%c0_10, %c0_11] : memref<1x128xf32, #tpu.memory_space<vmem>>, vector<1x128xf32>
    %25 = vector.broadcast %24 : vector<1x128xf32> to vector<8x128xf32>
    %26 = arith.mulf %23, %25 : vector<8x128xf32>
    %c0_12 = arith.constant 0 : index
    %c0_13 = arith.constant 0 : index
    %27 = vector.load %arg5[%c0_12, %c0_13] : memref<1x128xf32, #tpu.memory_space<vmem>>, vector<1x128xf32>
    %28 = vector.broadcast %27 : vector<1x128xf32> to vector<8x128xf32>
    %29 = arith.addf %26, %28 : vector<8x128xf32>
    %cst_14 = arith.constant 0.000000e+00 : f32
    %30 = vector.broadcast %cst_14 : f32 to vector<8x128xf32>
    %31 = arith.maximumf %29, %30 : vector<8x128xf32>
    %c0_15 = arith.constant 0 : index
    %c0_16 = arith.constant 0 : index
    %32 = vector.load %arg6[%c0_15, %c0_16] : memref<128x128xf32, #tpu.memory_space<vmem>>, vector<128x128xf32>
    %cst_17 = arith.constant dense<0.000000e+00> : vector<8x128xf32>
    %33 = tpu.matmul %31, %32, %cst_17 {dimension_numbers = #tpu.dot_dimension_numbers<[1], [0], [0], [1], [0, 0, 1, 1], [], []>} : vector<8x128xf32>, vector<128x128xf32>, vector<8x128xf32> -> vector<8x128xf32>
    %c0_18 = arith.constant 0 : index
    %c0_19 = arith.constant 0 : index
    %34 = vector.load %arg7[%c0_18, %c0_19] : memref<1x128xf32, #tpu.memory_space<vmem>>, vector<1x128xf32>
    %35 = vector.broadcast %34 : vector<1x128xf32> to vector<8x128xf32>
    %36 = arith.addf %33, %35 : vector<8x128xf32>
    %cst_20 = arith.constant dense<0.000000e+00> : vector<8xf32>
    %37 = vector.multi_reduction <add>, %36, %cst_20 [1] : vector<8x128xf32> to vector<8xf32>
    %38 = vector.shape_cast %37 : vector<8xf32> to vector<8x1xf32>
    %39 = arith.mulf %36, %36 : vector<8x128xf32>
    %cst_21 = arith.constant dense<0.000000e+00> : vector<8xf32>
    %40 = vector.multi_reduction <add>, %39, %cst_21 [1] : vector<8x128xf32> to vector<8xf32>
    %41 = vector.shape_cast %40 : vector<8xf32> to vector<8x1xf32>
    %cst_22 = arith.constant 1.562500e-02 : f32
    %42 = vector.broadcast %cst_22 : f32 to vector<8x1xf32>
    %43 = arith.mulf %38, %42 : vector<8x1xf32>
    %cst_23 = arith.constant 1.562500e-02 : f32
    %44 = vector.broadcast %cst_23 : f32 to vector<8x1xf32>
    %45 = arith.mulf %41, %44 : vector<8x1xf32>
    %46 = arith.mulf %43, %43 : vector<8x1xf32>
    %47 = arith.subf %45, %46 : vector<8x1xf32>
    %48 = vector.broadcast %43 : vector<8x1xf32> to vector<8x128xf32>
    %49 = arith.subf %36, %48 : vector<8x128xf32>
    %cst_24 = arith.constant 9.99999974E-6 : f32
    %50 = vector.broadcast %cst_24 : f32 to vector<8x1xf32>
    %51 = arith.addf %47, %50 : vector<8x1xf32>
    %52 = math.rsqrt %51 : vector<8x1xf32>
    %53 = vector.broadcast %52 : vector<8x1xf32> to vector<8x128xf32>
    %54 = arith.mulf %49, %53 : vector<8x128xf32>
    %c0_25 = arith.constant 0 : index
    %c0_26 = arith.constant 0 : index
    %55 = vector.load %arg8[%c0_25, %c0_26] : memref<1x128xf32, #tpu.memory_space<vmem>>, vector<1x128xf32>
    %56 = vector.broadcast %55 : vector<1x128xf32> to vector<8x128xf32>
    %57 = arith.mulf %54, %56 : vector<8x128xf32>
    %c0_27 = arith.constant 0 : index
    %c0_28 = arith.constant 0 : index
    %58 = vector.load %arg9[%c0_27, %c0_28] : memref<1x128xf32, #tpu.memory_space<vmem>>, vector<1x128xf32>
    %59 = vector.broadcast %58 : vector<1x128xf32> to vector<8x128xf32>
    %60 = arith.addf %57, %59 : vector<8x128xf32>
    %cst_29 = arith.constant 0.000000e+00 : f32
    %61 = vector.broadcast %cst_29 : f32 to vector<8x128xf32>
    %62 = arith.maximumf %60, %61 : vector<8x128xf32>
    %c0_30 = arith.constant 0 : index
    %c0_31 = arith.constant 0 : index
    %63 = vector.load %arg10[%c0_30, %c0_31] : memref<128x128xf32, #tpu.memory_space<vmem>>, vector<128x128xf32>
    %cst_32 = arith.constant dense<0.000000e+00> : vector<8x128xf32>
    %64 = tpu.matmul %62, %63, %cst_32 {dimension_numbers = #tpu.dot_dimension_numbers<[1], [0], [0], [1], [0, 0, 1, 1], [], []>} : vector<8x128xf32>, vector<128x128xf32>, vector<8x128xf32> -> vector<8x128xf32>
    %c0_33 = arith.constant 0 : index
    %c0_34 = arith.constant 0 : index
    %65 = vector.load %arg11[%c0_33, %c0_34] : memref<1x128xf32, #tpu.memory_space<vmem>>, vector<1x128xf32>
    %66 = vector.broadcast %65 : vector<1x128xf32> to vector<8x128xf32>
    %67 = arith.addf %64, %66 : vector<8x128xf32>
    %c0_35 = arith.constant 0 : index
    %c0_36 = arith.constant 0 : index
    %68 = vector.load %arg12[%c0_35, %c0_36] : memref<8x128xf32, #tpu.memory_space<vmem>>, vector<8x128xf32>
    tpu.vector_store %arg12[%c0_35, %c0_36], %67 {strides = array<i32>} : memref<8x128xf32, #tpu.memory_space<vmem>>, vector<8x128xf32>,
    return
  }
  func.func @transform_0(%arg0: i32) -> (i32, i32) {
    %c0_i32 = arith.constant 0 : i32
    %c0_i32_0 = arith.constant 0 : i32
    return %arg0, %c0_i32 : i32, i32
  }
  func.func @transform_1(%arg0: i32) -> (i32, i32) {
    %c0_i32 = arith.constant 0 : i32
    %c0_i32_0 = arith.constant 0 : i32
    %c0_i32_1 = arith.constant 0 : i32
    return %c0_i32, %c0_i32_0 : i32, i32
  }
  func.func @transform_2(%arg0: i32) -> (i32, i32) {
    %c0_i32 = arith.constant 0 : i32
    %c0_i32_0 = arith.constant 0 : i32
    %c0_i32_1 = arith.constant 0 : i32
    return %c0_i32, %c0_i32_0 : i32, i32
  }
  func.func @transform_3(%arg0: i32) -> (i32, i32) {
    %c0_i32 = arith.constant 0 : i32
    %c0_i32_0 = arith.constant 0 : i32
    %c0_i32_1 = arith.constant 0 : i32
    return %c0_i32, %c0_i32_0 : i32, i32
  }
  func.func @transform_4(%arg0: i32) -> (i32, i32) {
    %c0_i32 = arith.constant 0 : i32
    %c0_i32_0 = arith.constant 0 : i32
    %c0_i32_1 = arith.constant 0 : i32
    return %c0_i32, %c0_i32_0 : i32, i32
  }
  func.func @transform_5(%arg0: i32) -> (i32, i32) {
    %c0_i32 = arith.constant 0 : i32
    %c0_i32_0 = arith.constant 0 : i32
    %c0_i32_1 = arith.constant 0 : i32
    return %c0_i32, %c0_i32_0 : i32, i32
  }
  func.func @transform_6(%arg0: i32) -> (i32, i32) {
    %c0_i32 = arith.constant 0 : i32
    %c0_i32_0 = arith.constant 0 : i32
    %c0_i32_1 = arith.constant 0 : i32
    return %c0_i32, %c0_i32_0 : i32, i32
  }
  func.func @transform_7(%arg0: i32) -> (i32, i32) {
    %c0_i32 = arith.constant 0 : i32
    %c0_i32_0 = arith.constant 0 : i32
    %c0_i32_1 = arith.constant 0 : i32
    return %c0_i32, %c0_i32_0 : i32, i32
  }
  func.func @transform_8(%arg0: i32) -> (i32, i32) {
    %c0_i32 = arith.constant 0 : i32
    %c0_i32_0 = arith.constant 0 : i32
    %c0_i32_1 = arith.constant 0 : i32
    return %c0_i32, %c0_i32_0 : i32, i32
  }
  func.func @transform_9(%arg0: i32) -> (i32, i32) {
    %c0_i32 = arith.constant 0 : i32
    %c0_i32_0 = arith.constant 0 : i32
    %c0_i32_1 = arith.constant 0 : i32
    return %c0_i32, %c0_i32_0 : i32, i32
  }
  func.func @transform_10(%arg0: i32) -> (i32, i32) {
    %c0_i32 = arith.constant 0 : i32
    %c0_i32_0 = arith.constant 0 : i32
    %c0_i32_1 = arith.constant 0 : i32
    return %c0_i32, %c0_i32_0 : i32, i32
  }
  func.func @transform_11(%arg0: i32) -> (i32, i32) {
    %c0_i32 = arith.constant 0 : i32
    %c0_i32_0 = arith.constant 0 : i32
    return %arg0, %c0_i32 : i32, i32
  }
}

</mosaic_0001>

<bundles_post_ra>
// kernel: feature_encoder_forward.1
= control target key start
LH: loop header
LB: loop body
LE: loop exit
PB: predicated region body
PF: predicated region fallthrough
CT: control target
= control target key end

     0   :  { %v661_v3 = vmov 0.0|0.0   ;;  %vm662_vm0 = vmmov 0   ;;  %v663_v6 = vmov 0.0   ;;  %s932_s0 = inlined_call_operand.vmem [shape: f32[8,128], index: 0, kind: input, shape index: {}]   ;;  %s933_s1 = inlined_call_operand.vmem [shape: f32[128,128], index: 1, kind: input, shape index: {}]   ;;  %s934_s2 = inlined_call_operand.vmem [shape: f32[1,128], index: 2, kind: input, shape index: {}]   ;;  %s935_s3 = inlined_call_operand.vmem [shape: f32[1,128], index: 3, kind: input, shape index: {}]   ;;  %s936_s4 = inlined_call_operand.vmem [shape: f32[1,128], index: 4, kind: input, shape index: {}]   ;;  %s937_s5 = inlined_call_operand.vmem [shape: f32[128,128], index: 5, kind: input, shape index: {}]   ;;  %s938_s6 = inlined_call_operand.vmem [shape: f32[1,128], index: 6, kind: input, shape index: {}]   ;;  %s939_s7 = inlined_call_operand.vmem [shape: f32[1,128], index: 7, kind: input, shape index: {}]   ;;  %s940_s8 = inlined_call_operand.vmem [shape: f32[1,128], index: 8, kind: input, shape index: {}]   ;;  %s941_s9 = inlined_call_operand.vmem [shape: f32[128,128], index: 9, kind: input, shape index: {}]   ;;  %s942_s10 = inlined_call_operand.vmem [shape: f32[1,128], index: 10, kind: input, shape index: {}]   ;;  %s943_s11 = inlined_call_operand.hbm [shape: f32[8,128], index: 11, kind: output, shape index: {}]  }
   0x1   :  { %v40_v0 = vld [vmem:[%s933_s1] sm:$0xff]  ;;  %v41_v1 = vld [vmem:[%s933_s1 + $0x8] sm:$0xff]  ;;  %v42_v2 = vld [vmem:[%s933_s1 + $0x10] sm:$0xff]  ;;  %557 = vmatprep.subr.bf16.mxu0 %v661_v3  ;;  %484 = vmatprep.mubr.msk.f32.mxu0 %vm662_vm0, %v663_v6 }
   0x2   :  { %v558_v4 = vpack.c.bf16 %v41_v1, %v40_v0  ;;  %v43_v5 = vld [vmem:[%s933_s1 + $0x18] sm:$0xff]  ;;  %581 = vmatprep.subr.bf16.mxu1 %v661_v3  ;;  %519 = vmatprep.mubr.msk.f32.mxu1 %vm662_vm0, %v663_v6  ;;  %v44_v8 = vld [vmem:[%s933_s1 + $0x20] sm:$0xff]  ;;  %v45_v9 = vld [vmem:[%s933_s1 + $0x28] sm:$0xff] }
   0x3   :  { %v561_v7 = vpack.c.bf16 %v43_v5, %v42_v2 }
   0x4   :  { %559 = vmatpush3.bf16.msra.mxu0 %v558_v4 }
   0x5   :  { %560 = vmatprep.subr.bf16.mxu0 %v661_v3 }
   0x6   :  { %16 = vsyncpa [#allocation3], 0  ;;  %v564_v10 = vpack.c.bf16 %v45_v9, %v44_v8  ;;  %v46_v11 = vld [vmem:[%s933_s1 + $0x30] sm:$0xff]  ;;  %v47_v12 = vld [vmem:[%s933_s1 + $0x38] sm:$0xff] }
   0x7   :  { %v567_v13 = vpack.c.bf16 %v47_v12, %v46_v11  ;;  %v48_v14 = vld [vmem:[%s933_s1 + $0x40] sm:$0xff]  ;;  %v49_v15 = vld [vmem:[%s933_s1 + $0x48] sm:$0xff]  ;;  %v50_v17 = vld [vmem:[%s933_s1 + $0x50] sm:$0xff] }
   0x8   :  { %562 = vmatpush3.bf16.msra.mxu0 %v561_v7  ;;  %v570_v16 = vpack.c.bf16 %v49_v15, %v48_v14  ;;  %v51_v18 = vld [vmem:[%s933_s1 + $0x58] sm:$0xff]  ;;  %v52_v20 = vld [vmem:[%s933_s1 + $0x60] sm:$0xff]  ;;  %v53_v21 = vld [vmem:[%s933_s1 + $0x68] sm:$0xff] }
   0x9   :  { %563 = vmatprep.subr.bf16.mxu0 %v661_v3  ;;  %v573_v19 = vpack.c.bf16 %v51_v18, %v50_v17  ;;  %v576_v22 = vpack.c.bf16 %v53_v21, %v52_v20  ;;  %v54_v23 = vld [vmem:[%s933_s1 + $0x70] sm:$0xff]  ;;  %v55_v24 = vld [vmem:[%s933_s1 + $0x78] sm:$0xff]  ;;  %v39_v26 = vld [vmem:[%s932_s0] sm:$0xff]  ;;  %s664_s1 = smov [#allocation2]  }
   0xa   :  { %v579_v25 = vpack.c.bf16 %v55_v24, %v54_v23  ;;  %v163_v27 = vld [vmem:[%s937_s5] sm:$0xff]  ;;  %v164_v28 = vld [vmem:[%s937_s5 + $0x8] sm:$0xff]  ;;  %v165_v35 = vld [vmem:[%s937_s5 + $0x10] sm:$0xff]  ;;  %s386_s16 = sshll.u32 %s664_s1, 4  ;;  %s387_s16 = int_to_ptr.vmem [resolvable:$true] %s386_s16 }
   0xb   :  { %v582_v29 = vpack.c.bf16 %v164_v28, %v163_v27  ;;  %v394_v30 = vld [vmem:[%s934_s2] ss:$0 sm:$0xff]  ;;  %v166_v36 = vld [vmem:[%s937_s5 + $0x18] sm:$0xff]  ;;  %v168_v39 = vld [vmem:[%s937_s5 + $0x28] sm:$0xff]  ;;  %p642_p1 = scmp.lt.s32.totalorder %s387_s16, %s387_s16 }
   0xc   :  { %565 = vmatpush3.bf16.msra.mxu0 %v564_v10  ;;  %v585_v37 = vpack.c.bf16 %v166_v36, %v165_v35  ;;  %v167_v38 = vld [vmem:[%s937_s5 + $0x20] sm:$0xff]  ;;  %v169_v41 = vld [vmem:[%s937_s5 + $0x30] sm:$0xff]  ;;  %v170_v42 = vld [vmem:[%s937_s5 + $0x38] sm:$0xff] }
   0xd   :  { %566 = vmatprep.subr.bf16.mxu0 %v661_v3  ;;  %583 = vmatpush3.bf16.msra.mxu1 %v582_v29  ;;  %v588_v40 = vpack.c.bf16 %v168_v39, %v167_v38  ;;  %v591_v43 = vpack.c.bf16 %v170_v42, %v169_v41  ;;  %v171_v44 = vld [vmem:[%s937_s5 + $0x40] sm:$0xff]  ;;  %v172_v45 = vld [vmem:[%s937_s5 + $0x48] sm:$0xff]  ;;  %v173_v47 = vld [vmem:[%s937_s5 + $0x50] sm:$0xff] }
   0xe   :  { %584 = vmatprep.subr.bf16.mxu1 %v661_v3  ;;  %v594_v46 = vpack.c.bf16 %v172_v45, %v171_v44  ;;  %v174_v48 = vld [vmem:[%s937_s5 + $0x58] sm:$0xff]  ;;  %v175_v50 = vld [vmem:[%s937_s5 + $0x60] sm:$0xff]  ;;  %v176_v51 = vld [vmem:[%s937_s5 + $0x68] sm:$0xff] }
   0xf   :  { %v597_v49 = vpack.c.bf16 %v174_v48, %v173_v47  ;;  %v600_v52 = vpack.c.bf16 %v176_v51, %v175_v50  ;;  %v177_v53 = vld [vmem:[%s937_s5 + $0x70] sm:$0xff]  ;;  %v178_v54 = vld [vmem:[%s937_s5 + $0x78] sm:$0xff]  ;;  %v395_v1 = vld [vmem:[%s935_s3] ss:$0 sm:$0xff] }
  0x10   :  { %568 = vmatpush3.bf16.msra.mxu0 %v567_v13  ;;  %v603_v55 = vpack.c.bf16 %v178_v54, %v177_v53  ;;  %v396_v4 = vld [vmem:[%s936_s4] ss:$0 sm:$0xff]  ;;  %v287_v9 = vld [vmem:[%s941_s9 + $0x8] sm:$0xff]  ;;  %v289_v17 = vld [vmem:[%s941_s9 + $0x18] sm:$0xff] }
  0x11   :  { %569 = vmatprep.subr.bf16.mxu0 %v661_v3  ;;  %586 = vmatpush3.bf16.msra.mxu1 %v585_v37  ;;  %v286_v8 = vld [vmem:[%s941_s9] sm:$0xff]  ;;  %v291_v20 = vld [vmem:[%s941_s9 + $0x28] sm:$0xff]  ;;  %v293_v23 = vld [vmem:[%s941_s9 + $0x38] sm:$0xff] }
  0x12   :  { %587 = vmatprep.subr.bf16.mxu1 %v661_v3  ;;  %v606_v10 = vpack.c.bf16 %v287_v9, %v286_v8  ;;  %v397_v11 = vld [vmem:[%s938_s6] ss:$0 sm:$0xff]  ;;  %v296_v28 = vld [vmem:[%s941_s9 + $0x50] sm:$0xff]  ;;  %v297_v29 = vld [vmem:[%s941_s9 + $0x58] sm:$0xff] }
  0x13   :  { %v301_v35 = vld [vmem:[%s941_s9 + $0x78] sm:$0xff]  ;;  %v400_v51 = vld [vmem:[%s942_s10] ss:$0 sm:$0xff] }
  0x14   :  { %571 = vmatpush3.bf16.msra.mxu0 %v570_v16  ;;  %v288_v16 = vld [vmem:[%s941_s9 + $0x10] sm:$0xff] }
  0x15   :  { %572 = vmatprep.subr.bf16.mxu0 %v661_v3  ;;  %589 = vmatpush3.bf16.msra.mxu1 %v588_v40  ;;  %v609_v18 = vpack.c.bf16 %v289_v17, %v288_v16 }
  0x16   :  { %590 = vmatprep.subr.bf16.mxu1 %v661_v3 }
  0x18   :  { %574 = vmatpush3.bf16.msra.mxu0 %v573_v19  ;;  %v290_v19 = vld [vmem:[%s941_s9 + $0x20] sm:$0xff] }
  0x19   :  { %575 = vmatprep.subr.bf16.mxu0 %v661_v3  ;;  %592 = vmatpush3.bf16.msra.mxu1 %v591_v43  ;;  %v612_v21 = vpack.c.bf16 %v291_v20, %v290_v19 }
  0x1a   :  { %593 = vmatprep.subr.bf16.mxu1 %v661_v3 }
  0x1c   :  { %577 = vmatpush3.bf16.msra.mxu0 %v576_v22  ;;  %v292_v22 = vld [vmem:[%s941_s9 + $0x30] sm:$0xff] }
  0x1d   :  { %578 = vmatprep.subr.bf16.mxu0 %v661_v3  ;;  %595 = vmatpush3.bf16.msra.mxu1 %v594_v46  ;;  %v615_v24 = vpack.c.bf16 %v293_v23, %v292_v22  ;;  %v398_v46 = vld [vmem:[%s939_s7] ss:$0 sm:$0xff]  ;;  %s637_s7 = scalar_lea.vmem %s387_s16, 128 }
  0x1e   :  { %596 = vmatprep.subr.bf16.mxu1 %v661_v3  ;;  %p638_p0 = scmp.ne.s32.totalorder %s387_s16, %s637_s7  ;;  %p643_p2 = scmp.lt.s32.totalorder %s637_s7, %s637_s7 }
  0x20   :  { %580 = vmatpush3.bf16.msra.mxu0 %v579_v25  ;;  %v294_v25 = vld [vmem:[%s941_s9 + $0x40] sm:$0xff]  ;;  %p644_p3 = por %p643_p2, %p642_p1 }
  0x21   :  { %605 = vmatprep.subr.bf16.mxu0 %v661_v3  ;;  %598 = vmatpush3.bf16.msra.mxu1 %v597_v49 }
  0x22   :  { %599 = vmatprep.subr.bf16.mxu1 %v661_v3  ;;  %p645_p4 = pnand %p644_p3, %p638_p0 }
  0x23   :  { %485 = vmatmul.mubr.f32.vlgmr.msra.gmra.mrb[0].mxu0 %v39_v26  ;;  %v295_v26 = vld [vmem:[%s941_s9 + $0x48] sm:$0xff] }
  0x24   :  { %554 = vmatprep.mubr.msk.f32.mxu0 %vm662_vm0, %v663_v6  ;;  %607 = vmatpush3.bf16.msra.mxu0 %v606_v10  ;;  %v618_v27 = vpack.c.bf16 %v295_v26, %v294_v25 }
  0x25   :  { %601 = vmatpush3.bf16.msra.mxu1 %v600_v52  ;;  %608 = vmatprep.subr.bf16.mxu0 %v661_v3 }
  0x26   :  { %602 = vmatprep.subr.bf16.mxu1 %v661_v3 }
  0x28   :  { %610 = vmatpush3.bf16.msra.mxu0 %v609_v18 }
  0x29   :  { %604 = vmatpush3.bf16.msra.mxu1 %v603_v55  ;;  %611 = vmatprep.subr.bf16.mxu0 %v661_v3 }
  0x2c   :  { %613 = vmatpush3.bf16.msra.mxu0 %v612_v21 }
  0x2d   :  { %614 = vmatprep.subr.bf16.mxu0 %v661_v3 }
  0x30   :  { %616 = vmatpush3.bf16.msra.mxu0 %v615_v24 }
  0x31   :  { %617 = vmatprep.subr.bf16.mxu0 %v661_v3 }
  0x34   :  { %619 = vmatpush3.bf16.msra.mxu0 %v618_v27 }
  0x35   :  { %620 = vmatprep.subr.bf16.mxu0 %v661_v3 }
  0xf6   :  { %v129_v31 = vpop.f32.mrb[0].mxu0 }
  0xf7   :  { %v130_v32 = vadd.f32 %v394_v30, %v129_v31  ;;  %v486_v33 = vpop.f32.mrb[1].mxu0  ;;  %v621_v30 = vpack.c.bf16 %v297_v29, %v296_v28  ;;  %v298_v31 = vld [vmem:[%s941_s9 + $0x60] sm:$0xff] }
  0xf9   :  { %133 = vadd.xlane.f32.xlu0 %v130_v32  ;;  %v135_v34 = vmul.f32 %v130_v32, %v130_v32  ;;  %622 = vmatpush3.bf16.msra.mxu0 %v621_v30 }
  0xfa   :  { %623 = vmatprep.subr.bf16.mxu0 %v661_v3 }
  0xfd   :  { %136 = vadd.xlane.f32.xlu0 %v135_v34  ;;  %v300_v34 = vld [vmem:[%s941_s9 + $0x70] sm:$0xff] }
  0xfe   :  { %v627_v36 = vpack.c.bf16 %v301_v35, %v300_v34 }
 0x186   :  { %v134_v56 = vpop.xlane.xlu0 %133 }
 0x187   :  { %v138_v57 = vmul.f32 0.015625, %v134_v56 }
 0x189   :  { %v140_v59 = vmul.f32 %v138_v57, %v138_v57  ;;  %v142_v63 = vsub.f32 %v130_v32, %v138_v57  ;;  %v299_v32 = vld [vmem:[%s941_s9 + $0x68] sm:$0xff] }
 0x18a   :  { %v137_v58 = vpop.xlane.xlu0 %136  ;;  %v624_v33 = vpack.c.bf16 %v299_v32, %v298_v31 }
 0x18b   :  { %v139_v60 = vmul.f32 0.015625, %v137_v58 }
 0x18c   :  { %625 = vmatpush3.bf16.msra.mxu0 %v624_v33 }
 0x18d   :  { %v141_v61 = vsub.f32 %v139_v60, %v140_v59  ;;  %626 = vmatprep.subr.bf16.mxu0 %v661_v3  ;;  %v399_v3 = vld [vmem:[%s940_s8] ss:$0 sm:$0xff] }
 0x18f   :  { %v143_v62 = vadd.f32 1e-05, %v141_v61 }
 0x190   :  { %628 = vmatpush3.bf16.msra.mxu0 %v627_v36 }
 0x191   :  { %633 = vrsqrt.f32 %v143_v62 }
 0x19b   :  { %v634_v0 = vpop.eup %633 }
 0x19c   :  { %v145_v2 = vmul.f32 %v634_v0, %v142_v63 }
 0x19e   :  { %v153_v5 = vmul.f32 %v395_v1, %v145_v2 }
 0x1a0   :  { %v161_v6 = vadd.f32 %v396_v4, %v153_v5 }
 0x1a2   :  { %v162_v7 = vmax.f32 %v161_v6, 0.0 }
 0x1a4   :  { %520 = vmatmul.mubr.f32.vlgmr.msra.gmra.mrb[0].mxu1 %v162_v7 }
 0x277   :  { %v252_v12 = vpop.f32.mrb[0].mxu1 }
 0x278   :  { %v253_v13 = vadd.f32 %v397_v11, %v252_v12  ;;  %v521_v14 = vpop.f32.mrb[1].mxu1 }
 0x27a   :  { %256 = vadd.xlane.f32.xlu1 %v253_v13  ;;  %v258_v15 = vmul.f32 %v253_v13, %v253_v13 }
 0x27e   :  { %259 = vadd.xlane.f32.xlu1 %v258_v15 }
 0x307   :  { %v257_v37 = vpop.xlane.xlu1 %256 }
 0x308   :  { %v261_v38 = vmul.f32 0.015625, %v257_v37 }
 0x30a   :  { %v263_v40 = vmul.f32 %v261_v38, %v261_v38  ;;  %v265_v44 = vsub.f32 %v253_v13, %v261_v38 }
 0x30b   :  { %v260_v39 = vpop.xlane.xlu1 %259 }
 0x30c   :  { %v262_v41 = vmul.f32 0.015625, %v260_v39 }
 0x30e   :  { %v264_v42 = vsub.f32 %v262_v41, %v263_v40 }
 0x310   :  { %v266_v43 = vadd.f32 1e-05, %v264_v42 }
 0x312   :  { %635 = vrsqrt.f32 %v266_v43 }
 0x31c   :  { %v636_v45 = vpop.eup %635 }
 0x31d   :  { %v268_v47 = vmul.f32 %v636_v45, %v265_v44 }
 0x31f   :  { %v276_v48 = vmul.f32 %v398_v46, %v268_v47 }
 0x321   :  { %v284_v49 = vadd.f32 %v399_v3, %v276_v48 }
 0x323   :  { %v285_v50 = vmax.f32 %v284_v49, 0.0 }
 0x325   :  { %555 = vmatmul.mubr.f32.vlgmr.msra.gmra.mrb[2].mxu0 %v285_v50 }
 0x3f8   :  { %v375_v52 = vpop.f32.mrb[2].mxu0 }
 0x3f9   :  { %v376_v53 = vadd.f32 %v400_v51, %v375_v52  ;;  %v556_v54 = vpop.f32.mrb[3].mxu0 }
 0x3fb   :  { %379 = vst [vmem:[#allocation2] sm:$0xff] %v376_v53 }
 0x3fc   :  { %648 = shalt.err (!%p645_p4)
}
 0x3fd   :  { %s649_s0 = scalar_lea.hbm %s943_s11, 128 }
 0x3fe   :  { %p650_p5 = scmp.ne.s32.totalorder %s943_s11, %s649_s0  ;;  %p653_p6 = scmp.lt.u32.totalorder %s649_s0, %s943_s11 }
 0x400   :  { %p655_p7 = pnand %p653_p6, %p650_p5 }
 0x402   :  { %658 = shalt.err (!%p655_p7)
}
 0x403   :  { %389 = dma.vmem_to_hbm [thread:$0]  %s387_s16, 128, %s943_s11, [#allocation3]  }
 0x404   :  { %659 = dma.done.wait [#allocation3], 128  }
 0x405   :  { %660 = vsyncadd [#allocation3], 4294967168 }
 0x406   :  { %393 = vsyncpa [#allocation3], 1 }

</bundles_post_ra>
